<compile_context>
chip_gen: v6e
topology: v6e:2x2x1
jax: 0.10.0
libtpu: 0.0.40
codegen_flags: <defaults>
</compile_context>

<pallas_src>
import math
from functools import partial

import jax
import jax.numpy as jnp
from jax.experimental import pallas as pl
from jax.experimental.pallas import tpu as pltpu


# ---------------------------------------------------------------------------
# kernel
# ---------------------------------------------------------------------------
def _rmsnorm_kernel(x_ref, w_ref, o_ref, *, eps, dim, fold):
    """One (tm, fold*dim) row tile of RMSNorm.

    When fold > 1, `fold` consecutive logical rows are packed along the lane
    axis (so HBM blocks are lane-dense); each dim-wide segment is normalized
    independently, preserving per-row semantics.
    """
    x32 = x_ref[...].astype(jnp.float32)          # x.float()
    w32 = w_ref[...].astype(jnp.float32)          # f32 weight row (tiled if folded)

    if fold == 1:
        ms = jnp.mean(x32 * x32, axis=-1, keepdims=True)
        normed32 = x32 * jax.lax.rsqrt(ms + eps)
    else:
        parts = []
        for j in range(fold):                     # static, small (<= 16)
            seg = x32[:, j * dim:(j + 1) * dim]
            ms = jnp.mean(seg * seg, axis=-1, keepdims=True)
            parts.append(seg * jax.lax.rsqrt(ms + eps))
        normed32 = jnp.concatenate(parts, axis=-1)

    normed = normed32.astype(x_ref.dtype)         # .type_as(x)
    o_ref[...] = (normed.astype(jnp.float32) * w32).astype(o_ref.dtype)


# ---------------------------------------------------------------------------
# sizing helpers
# ---------------------------------------------------------------------------
def _round_up(v, m):
    return ((v + m - 1) // m) * m


def _sublane_packing(dtype) -> int:
    # minimum sublane multiple for the (8,128) / dtype-packing block constraint
    return max(8, 32 // jnp.dtype(dtype).itemsize)


def _vmem_capacity_bytes() -> int:
    try:
        return int(pltpu.get_tpu_info().vmem_capacity_bytes)
    except Exception:
        pass
    try:
        kind = jax.devices()[0].device_kind.lower()
        if "v7" in kind:
            return 64 * 1024 * 1024               # per-TC on v7x
        if "v4" in kind or "v5" in kind or "v6" in kind:
            return 128 * 1024 * 1024
    except Exception:
        pass
    return 64 * 1024 * 1024                       # conservative: fits every gen


def _num_tensorcores() -> int:
    try:
        info = pltpu.get_tpu_info()
        for attr in ("num_cores", "core_count", "num_tensorcores"):
            v = getattr(info, attr, None)
            if v:
                return int(v)
    except Exception:
        pass
    try:
        kind = jax.devices()[0].device_kind.lower()
        if "v7" in kind or "v5p" in kind or "v4" in kind:
            return 2                               # grid "parallel" axis shards across TCs
    except Exception:
        pass
    return 1


def _pick_row_tile(rows, width, x_bytes, out_bytes, packing, vmem_cap, num_cores):
    """Largest packing-aligned row tile whose VMEM footprint (double-buffered
    x/out blocks + ~2 full-tile f32 temporaries) fits ~65% of VMEM, with an
    even >=2-steps-per-core clamp only on multi-TensorCore chips."""
    per_row = width * (2 * (x_bytes + out_bytes) + 2 * 4)   # dbl-buffer + f32 temps
    budget = int(0.65 * vmem_cap)
    tm = max(packing, (budget // max(1, per_row)) // packing * packing)

    rows_rounded = _round_up(rows, packing)
    tm = max(packing, min(tm, rows_rounded))

    if num_cores >= 2 and rows_rounded >= 2 * num_cores * packing:
        steps = pl.cdiv(rows, tm)
        target = max(steps, 2 * num_cores)         # >= 2 steps per core
        if target % 2:
            target += 1                            # even -> balanced across cores
        if target > steps:
            tm_t = _round_up(pl.cdiv(rows, target), packing)
            tm = max(packing, min(tm, tm_t))
    return tm


# ---------------------------------------------------------------------------
# wrapper
# ---------------------------------------------------------------------------
def rmsnorm(x, weight, eps=1e-5, out_dtype=None):
    """RMSNorm over the last axis of x, matching RMSNormRef.forward.

    x: (..., dim); weight: (dim,). Default output dtype follows the PyTorch
    promotion of `normed.type_as(x) * weight`; pass out_dtype=x.dtype for a
    bandwidth-saving opt-in fast path.
    """
    orig_shape = x.shape
    dim = int(orig_shape[-1])
    rows = 1
    for s in orig_shape[:-1]:
        rows *= int(s)

    if out_dtype is None:
        out_dtype = jnp.promote_types(x.dtype, weight.dtype)
    out_dtype = jnp.dtype(out_dtype)

    # --- lane-dense folding for small dims that are not a multiple of 128 ---
    fold = 1
    if dim % 128 != 0 and dim < 512:
        k = 128 // math.gcd(dim, 128)
        if k > 1 and rows % k == 0:
            fold = k
    width = dim * fold
    rows_f = rows // fold

    x2d = x.reshape(rows_f, width)
    if fold > 1:
        w_row = jnp.tile(weight.reshape(-1), fold).reshape(1, width)
    else:
        w_row = weight.reshape(1, dim)

    x_bytes = jnp.dtype(x.dtype).itemsize
    out_bytes = out_dtype.itemsize
    w_bytes = jnp.dtype(weight.dtype).itemsize

    packing = max(_sublane_packing(x.dtype), _sublane_packing(out_dtype))
    vmem_cap = _vmem_capacity_bytes()
    num_cores = _num_tensorcores()
    tm = _pick_row_tile(rows_f, width, x_bytes, out_bytes, packing, vmem_cap,
                        num_cores)

    grid = (pl.cdiv(rows_f, tm),)   # ragged rows -> masked partial last block

    # scoped-VMEM budget: double-buffered x/out blocks + ~2 f32 full-tile temps
    # + resident weight + compiler slack.
    need = tm * width * (2 * (x_bytes + out_bytes) + 8) + 2 * width * w_bytes + (4 << 20)
    vmem_limit = int(min(max(need, 32 << 20), int(0.9 * vmem_cap)))

    cost = pl.CostEstimate(
        flops=4 * rows * dim,
        transcendentals=rows,
        bytes_accessed=rows * dim * (x_bytes + out_bytes) + dim * w_bytes,
    )

    kernel = partial(_rmsnorm_kernel, eps=float(eps), dim=dim, fold=fold)

    out2d = pl.pallas_call(
        kernel,
        out_shape=jax.ShapeDtypeStruct((rows_f, width), out_dtype),
        grid_spec=pltpu.PrefetchScalarGridSpec(
            num_scalar_prefetch=0,
            grid=grid,
            in_specs=[
                pl.BlockSpec((tm, width), lambda i: (i, 0)),
                pl.BlockSpec((1, width), lambda i: (0, 0)),   # resident weight row
            ],
            out_specs=pl.BlockSpec((tm, width), lambda i: (i, 0)),
        ),
        compiler_params=pltpu.CompilerParams(
            dimension_semantics=("parallel",),
            vmem_limit_bytes=vmem_limit,
        ),
        cost_estimate=cost,
    )(x2d, w_row)

    return out2d.reshape(orig_shape)


# ---------------------------------------------------------------------------
# pure-JAX reference (mirrors the PyTorch module)
# ---------------------------------------------------------------------------
def rmsnorm_ref(x, weight, eps=1e-5):
    x32 = x.astype(jnp.float32)
    ms = jnp.mean(x32 * x32, axis=-1, keepdims=True)
    normed = (x32 * jax.lax.rsqrt(ms + eps)).astype(x.dtype)
    return normed * weight


if __name__ == "__main__":
    key = jax.random.PRNGKey(0)
    k1, k2, k3 = jax.random.split(key, 3)

    # --- primary check: module-sized shapes (batch=2, seq=8, hidden=32) -----
    batch, seq, hidden = 2, 8, 32
    x = jax.random.normal(k1, (batch, seq, hidden), dtype=jnp.float32)
    # nn.Parameter(torch.ones(dim)) -> ones; perturb so the multiply is exercised
    weight = jnp.ones((hidden,), dtype=jnp.float32) + 0.01 * jnp.arange(
        hidden, dtype=jnp.float32
    )
    out = jax.block_until_ready(rmsnorm(x, weight, eps=1e-5))
    ref = rmsnorm_ref(x, weight, eps=1e-5)
    assert out.shape == x.shape and out.dtype == ref.dtype
    assert jnp.allclose(out, ref, atol=1e-5, rtol=1e-5)

    # --- ragged rows (rows % tile != 0), lane-dense dim ----------------------
    x_r = jax.random.normal(k2, (3, 5, 256), dtype=jnp.float32)
    w_r = jnp.ones((256,), dtype=jnp.float32) + 0.001 * jnp.arange(
        256, dtype=jnp.float32
    )
    out_r = jax.block_until_ready(rmsnorm(x_r, w_r, eps=1e-5))
    ref_r = rmsnorm_ref(x_r, w_r, eps=1e-5)
    assert jnp.allclose(out_r, ref_r, atol=1e-5, rtol=1e-5)

    # --- bf16 input: default f32 promotion + opt-in bf16 fast path ----------
    x_b = jax.random.normal(k3, (2, 16, 128), dtype=jnp.bfloat16)
    w_b = jnp.ones((128,), dtype=jnp.float32) + 0.01 * jnp.arange(
        128, dtype=jnp.float32
    )
    out_b = jax.block_until_ready(rmsnorm(x_b, w_b, eps=1e-5))
    ref_b = rmsnorm_ref(x_b, w_b, eps=1e-5)
    assert out_b.dtype == jnp.float32
    assert jnp.allclose(out_b, ref_b, atol=3e-2, rtol=3e-2)

    out_b16 = jax.block_until_ready(rmsnorm(x_b, w_b, eps=1e-5,
                                            out_dtype=jnp.bfloat16))
    assert out_b16.dtype == jnp.bfloat16
    assert jnp.allclose(out_b16.astype(jnp.float32), ref_b, atol=5e-2, rtol=5e-2)

    print("KERNEL_OK")
</pallas_src>

<mosaic_0001>
module attributes {stable_mosaic.version = 11 : i64} {
  func.func @_rmsnorm_kernel(%arg0: i32, %arg1: memref<8x128xf32, #tpu.memory_space<vmem>>, %arg2: memref<1x128xf32, #tpu.memory_space<vmem>>, %arg3: memref<8x128xf32, #tpu.memory_space<vmem>>) attributes {dimension_semantics = [#tpu.dimension_semantics<parallel>], iteration_bounds = array<i64: 1>, scalar_prefetch = 0 : i64, scratch_operands = 0 : i64, tpu.core_type = #tpu.core_type<tc>, window_params = [{transform_indices = @transform_0, window_bounds = array<i64: 8, 128>}, {pipeline_mode = #tpu.pipeline_mode<synchronous>, transform_indices = @transform_1, window_bounds = array<i64: 1, 128>}, {transform_indices = @transform_2, window_bounds = array<i64: 8, 128>}]} {
    %c0 = arith.constant 0 : index
    %c0_0 = arith.constant 0 : index
    %0 = vector.load %arg1[%c0, %c0_0] : memref<8x128xf32, #tpu.memory_space<vmem>>, vector<8x128xf32>
    %c0_1 = arith.constant 0 : index
    %c0_2 = arith.constant 0 : index
    %1 = vector.load %arg2[%c0_1, %c0_2] : memref<1x128xf32, #tpu.memory_space<vmem>>, vector<1x128xf32>
    %2 = vector.extract_strided_slice %0 {offsets = [0, 0], sizes = [8, 32], strides = [1, 1]} : vector<8x128xf32> to vector<8x32xf32>
    %3 = arith.mulf %2, %2 : vector<8x32xf32>
    %cst = arith.constant dense<0.000000e+00> : vector<8xf32>
    %4 = vector.multi_reduction <add>, %3, %cst [1] : vector<8x32xf32> to vector<8xf32>
    %5 = vector.shape_cast %4 : vector<8xf32> to vector<8x1xf32>
    %cst_3 = arith.constant 3.200000e+01 : f32
    %6 = vector.broadcast %cst_3 : f32 to vector<8x1xf32>
    %7 = arith.divf %5, %6 : vector<8x1xf32>
    %cst_4 = arith.constant 9.99999974E-6 : f32
    %8 = vector.broadcast %cst_4 : f32 to vector<8x1xf32>
    %9 = arith.addf %7, %8 : vector<8x1xf32>
    %10 = math.rsqrt %9 : vector<8x1xf32>
    %11 = vector.broadcast %10 : vector<8x1xf32> to vector<8x32xf32>
    %12 = arith.mulf %2, %11 : vector<8x32xf32>
    %13 = vector.extract_strided_slice %0 {offsets = [0, 32], sizes = [8, 32], strides = [1, 1]} : vector<8x128xf32> to vector<8x32xf32>
    %14 = arith.mulf %13, %13 : vector<8x32xf32>
    %cst_5 = arith.constant dense<0.000000e+00> : vector<8xf32>
    %15 = vector.multi_reduction <add>, %14, %cst_5 [1] : vector<8x32xf32> to vector<8xf32>
    %16 = vector.shape_cast %15 : vector<8xf32> to vector<8x1xf32>
    %cst_6 = arith.constant 3.200000e+01 : f32
    %17 = vector.broadcast %cst_6 : f32 to vector<8x1xf32>
    %18 = arith.divf %16, %17 : vector<8x1xf32>
    %cst_7 = arith.constant 9.99999974E-6 : f32
    %19 = vector.broadcast %cst_7 : f32 to vector<8x1xf32>
    %20 = arith.addf %18, %19 : vector<8x1xf32>
    %21 = math.rsqrt %20 : vector<8x1xf32>
    %22 = vector.broadcast %21 : vector<8x1xf32> to vector<8x32xf32>
    %23 = arith.mulf %13, %22 : vector<8x32xf32>
    %24 = vector.extract_strided_slice %0 {offsets = [0, 64], sizes = [8, 32], strides = [1, 1]} : vector<8x128xf32> to vector<8x32xf32>
    %25 = arith.mulf %24, %24 : vector<8x32xf32>
    %cst_8 = arith.constant dense<0.000000e+00> : vector<8xf32>
    %26 = vector.multi_reduction <add>, %25, %cst_8 [1] : vector<8x32xf32> to vector<8xf32>
    %27 = vector.shape_cast %26 : vector<8xf32> to vector<8x1xf32>
    %cst_9 = arith.constant 3.200000e+01 : f32
    %28 = vector.broadcast %cst_9 : f32 to vector<8x1xf32>
    %29 = arith.divf %27, %28 : vector<8x1xf32>
    %cst_10 = arith.constant 9.99999974E-6 : f32
    %30 = vector.broadcast %cst_10 : f32 to vector<8x1xf32>
    %31 = arith.addf %29, %30 : vector<8x1xf32>
    %32 = math.rsqrt %31 : vector<8x1xf32>
    %33 = vector.broadcast %32 : vector<8x1xf32> to vector<8x32xf32>
    %34 = arith.mulf %24, %33 : vector<8x32xf32>
    %35 = vector.extract_strided_slice %0 {offsets = [0, 96], sizes = [8, 32], strides = [1, 1]} : vector<8x128xf32> to vector<8x32xf32>
    %36 = arith.mulf %35, %35 : vector<8x32xf32>
    %cst_11 = arith.constant dense<0.000000e+00> : vector<8xf32>
    %37 = vector.multi_reduction <add>, %36, %cst_11 [1] : vector<8x32xf32> to vector<8xf32>
    %38 = vector.shape_cast %37 : vector<8xf32> to vector<8x1xf32>
    %cst_12 = arith.constant 3.200000e+01 : f32
    %39 = vector.broadcast %cst_12 : f32 to vector<8x1xf32>
    %40 = arith.divf %38, %39 : vector<8x1xf32>
    %cst_13 = arith.constant 9.99999974E-6 : f32
    %41 = vector.broadcast %cst_13 : f32 to vector<8x1xf32>
    %42 = arith.addf %40, %41 : vector<8x1xf32>
    %43 = math.rsqrt %42 : vector<8x1xf32>
    %44 = vector.broadcast %43 : vector<8x1xf32> to vector<8x32xf32>
    %45 = arith.mulf %35, %44 : vector<8x32xf32>
    %46 = tpu.concatenate %12, %23, %34, %45 in 1 : vector<8x32xf32>, vector<8x32xf32>, vector<8x32xf32>, vector<8x32xf32> -> vector<8x128xf32>
    %47 = vector.broadcast %1 : vector<1x128xf32> to vector<8x128xf32>
    %48 = arith.mulf %46, %47 : vector<8x128xf32>
    %c0_14 = arith.constant 0 : index
    %c0_15 = arith.constant 0 : index
    %49 = vector.load %arg3[%c0_14, %c0_15] : memref<8x128xf32, #tpu.memory_space<vmem>>, vector<8x128xf32>
    tpu.vector_store %arg3[%c0_14, %c0_15], %48 {strides = array<i32>} : memref<8x128xf32, #tpu.memory_space<vmem>>, vector<8x128xf32>,
    return
  }
  func.func @transform_0(%arg0: i32) -> (i32, i32) {
    %c0_i32 = arith.constant 0 : i32
    %c0_i32_0 = arith.constant 0 : i32
    return %arg0, %c0_i32 : i32, i32
  }
  func.func @transform_1(%arg0: i32) -> (i32, i32) {
    %c0_i32 = arith.constant 0 : i32
    %c0_i32_0 = arith.constant 0 : i32
    %c0_i32_1 = arith.constant 0 : i32
    return %c0_i32, %c0_i32_0 : i32, i32
  }
  func.func @transform_2(%arg0: i32) -> (i32, i32) {
    %c0_i32 = arith.constant 0 : i32
    %c0_i32_0 = arith.constant 0 : i32
    return %arg0, %c0_i32 : i32, i32
  }
}

</mosaic_0001>

<bundles_post_ra>
// kernel: tpu_custom_call.1
= control target key start
LH: loop header
LB: loop body
LE: loop exit
PB: predicated region body
PF: predicated region fallthrough
CT: control target
= control target key end

     0   :  { %7 = vsyncpa [#allocation3], 0  ;;  %s200_s0 = inlined_call_operand.hbm [shape: f32[4,128], index: 0, kind: input, shape index: {}]   ;;  %s201_s1 = inlined_call_operand.vmem [shape: f32[1,128], index: 1, kind: input, shape index: {}]   ;;  %s202_s2 = inlined_call_operand.hbm [shape: f32[4,128], index: 2, kind: output, shape index: {}]  }
   0x1   :  { %8 = vsyncpa [#allocation4], 0 }
   0x2   :  { %13 = vsyncadd [#allocation3], 64  ;;  %s158_s9 = smov [#allocation2]  }
   0x3   :  { %s14_s10 = sshll.u32 %s158_s9, 4  ;;  %s15_s10 = int_to_ptr.vmem [resolvable:$true] %s14_s10 }
   0x4   :  { %s122_s11 = scalar_lea.vmem %s15_s10, 64  ;;  %s126_s12 = scalar_lea.vmem %s15_s10, 128 }
   0x5   :  { %p123_p0 = scmp.ne.s32.totalorder %s15_s10, %s122_s11  ;;  %p127_p1 = scmp.lt.s32.totalorder %s15_s10, %s15_s10 }
   0x6   :  { %p128_p2 = scmp.lt.s32.totalorder %s126_s12, %s122_s11 }
   0x8   :  { %p129_p3 = por %p128_p2, %p127_p1 }
   0xa   :  { %p130_p4 = pnand %p129_p3, %p123_p0 }
   0xc   :  { %133 = shalt.err (!%p130_p4)
}
   0xd   :  { %s159_s13 = smov 64   ;;  %s160_s14 = smov 4  }
   0xe   :  { %20 = dma.hbm_to_vmem [thread:$0]  %s200_s0, 64, %s15_s10, [#allocation3], %s159_s13, %s159_s13, %s160_s14  }
   0xf   :  { %154 = dma.done.wait [#allocation3], 128  }
  0x10   :  { %155 = vsyncadd [#allocation3], 4294967168  ;;  %v26_v0 = vld [vmem:[#allocation2] sm:$0xff]  ;;  %s161_s17 = smov 96   ;;  %s162_s18 = smov 32   ;;  %vm29_vm0 = vcmask 261120  }
  0x11   :  { %v28_v1 = vmul.f32 %v26_v0, %v26_v0  ;;  %vm70_vm1 = vcmask 523264   ;;  %vm72_vm2 = vcmask 785408   ;;  %v99_v29 = vld [vmem:[%s201_s1] ss:$0 sm:$0xff] }
  0x13   :  { %39 = vrot.lane.b32.xlu0 %v28_v1, %s161_s17  ;;  %59 = vrot.lane.b32.xlu1 %v28_v1, %s162_s18  ;;  %v30_v2 = vsel %vm29_vm0, %v28_v1, 0.0 }
  0x17   :  { %49 = vrot.lane.b32.xlu0 %v28_v1, %s159_s13 }
  0x37   :  { %31 = vadd.xlane.f32.xlu1 %v30_v2 }
  0x85   :  { %v40_v3 = vpop.permute.xlu0 %39  ;;  %v60_v4 = vpop.permute.xlu1 %59 }
  0x86   :  { %v42_v5 = vsel %vm29_vm0, %v40_v3, 0.0  ;;  %v62_v6 = vsel %vm29_vm0, %v60_v4, 0.0 }
  0x87   :  { %43 = vadd.xlane.f32.xlu0 %v42_v5  ;;  %63 = vadd.xlane.f32.xlu1 %v62_v6 }
  0x89   :  { %v50_v7 = vpop.permute.xlu0 %49 }
  0x8a   :  { %v52_v8 = vsel %vm29_vm0, %v50_v7, 0.0 }
  0x8b   :  { %53 = vadd.xlane.f32.xlu0 %v52_v8 }
  0xc0   :  { %v32_v9 = vpop.xlane.xlu1 %31 }
  0xc1   :  { %v34_v10 = vmul.f32 0.03125, %v32_v9 }
  0xc3   :  { %v35_v12 = vadd.f32 1e-05, %v34_v10 }
  0xc5   :  { %106 = vrsqrt.f32 %v35_v12 }
  0xd2   :  { %v107_v21 = vpop.eup %106 }
  0xd3   :  { %v37_v25 = vmul.f32 %v107_v21, %v26_v0 }
 0x110   :  { %v44_v11 = vpop.xlane.xlu0 %43  ;;  %v64_v13 = vpop.xlane.xlu1 %63 }
 0x111   :  { %v45_v14 = vmul.f32 0.03125, %v44_v11  ;;  %v65_v15 = vmul.f32 0.03125, %v64_v13 }
 0x113   :  { %v46_v16 = vadd.f32 1e-05, %v45_v14  ;;  %v66_v17 = vadd.f32 1e-05, %v65_v15 }
 0x114   :  { %v54_v18 = vpop.xlane.xlu0 %53 }
 0x115   :  { %108 = vrsqrt.f32 %v46_v16  ;;  %v55_v19 = vmul.f32 0.03125, %v54_v18 }
 0x116   :  { %110 = vrsqrt.f32 %v66_v17 }
 0x117   :  { %v56_v20 = vadd.f32 1e-05, %v55_v19 }
 0x119   :  { %112 = vrsqrt.f32 %v56_v20 }
 0x122   :  { %v109_v22 = vpop.eup %108 }
 0x123   :  { %v111_v23 = vpop.eup %110  ;;  %v48_v24 = vmul.f32 %v109_v22, %v26_v0 }
 0x124   :  { %v68_v27 = vmul.f32 %v111_v23, %v26_v0 }
 0x125   :  { %v69_v30 = vsel %vm29_vm0, %v37_v25, %v48_v24 }
 0x126   :  { %v113_v26 = vpop.eup %112 }
 0x127   :  { %v58_v28 = vmul.f32 %v113_v26, %v26_v0 }
 0x129   :  { %v71_v31 = vsel %vm70_vm1, %v69_v30, %v58_v28 }
 0x12a   :  { %v73_v32 = vsel %vm72_vm2, %v71_v31, %v68_v27 }
 0x12b   :  { %v80_v33 = vmul.f32 %v99_v29, %v73_v32 }
 0x12d   :  { %81 = vst [vmem:[#allocation5] sm:$0xff] %v80_v33 }
 0x12e   :  { %86 = vsyncadd [#allocation4], 64  ;;  %s163_s20 = smov [#allocation5]  }
 0x12f   :  { %s87_s21 = sshll.u32 %s163_s20, 4  ;;  %s88_s21 = int_to_ptr.vmem [resolvable:$true] %s87_s21 }
 0x130   :  { %s134_s22 = scalar_lea.vmem %s88_s21, 64  ;;  %s138_s23 = scalar_lea.vmem %s88_s21, 128 }
 0x131   :  { %p135_p5 = scmp.ne.s32.totalorder %s88_s21, %s134_s22  ;;  %p139_p6 = scmp.lt.s32.totalorder %s88_s21, %s88_s21 }
 0x132   :  { %p140_p7 = scmp.lt.s32.totalorder %s138_s23, %s134_s22 }
 0x134   :  { %p141_p8 = por %p140_p7, %p139_p6 }
 0x136   :  { %p142_p9 = pnand %p141_p8, %p135_p5 }
 0x138   :  { %145 = shalt.err (!%p142_p9)
}
 0x139   :  { %93 = dma.vmem_to_hbm [thread:$0]  %s88_s21, 64, %s202_s2, [#allocation4], %s159_s13, %s159_s13, %s160_s14  }
 0x13a   :  { %156 = dma.done.wait [#allocation4], 128  }
 0x13b   :  { %157 = vsyncadd [#allocation4], 4294967168 }
 0x13c   :  { %97 = vsyncpa [#allocation3], 1 }
 0x13d   :  { %98 = vsyncpa [#allocation4], 1 }

</bundles_post_ra>
